<compile_context>
chip_gen: v6e
topology: v6e:2x2x1
jax: 0.10.0
libtpu: 0.0.40
codegen_flags: <defaults>
</compile_context>

<pallas_src>
import jax
import jax.numpy as jnp
from jax.experimental import pallas as pl
from jax.experimental.pallas import tpu as pltpu


def _similarity_partial_kernel(q_ref, k_ref, out_ref):
    """Accumulate sum(q*k) for this split into a resident (1, 8, 128) f32 block.

    q_ref, k_ref : VMEM tiles of shape (tile_rows, 128) in the input dtype.
    out_ref      : (1, 8, 128) f32 output block, resident across grid axis 1.
    """
    i = pl.program_id(1)

    @pl.when(i == 0)
    def _():
        out_ref[...] = jnp.zeros_like(out_ref)

    # VPU-only hot path: cast + elementwise multiply + vreg-wise adds
    # (reduction over the non-minor axis). No XLU reduce, no SMEM round trip.
    prod = q_ref[...].astype(jnp.float32) * k_ref[...].astype(jnp.float32)
    out_ref[...] += prod.reshape(-1, 8, 128).sum(axis=0).reshape(1, 8, 128)


def _tpu_defaults():
    """Best-effort hardware detection; safe fallbacks if unavailable."""
    num_splits = 1                       # correct & optimal on 1-TC v5e/v6e
    vmem_limit = 48 * 1024 * 1024        # fits v7x's 64 MiB physical VMEM
    try:
        info = pltpu.get_tpu_info()
        vmem = getattr(info, "vmem_capacity_bytes", None)
        if vmem:
            # Leave headroom; on 128 MiB chips this raises the scoped limit.
            vmem_limit = max(vmem_limit, min(96 * 1024 * 1024, (vmem * 3) // 4))
        for attr in ("num_tensorcores", "tensorcores_per_chip",
                     "num_cores", "cores_per_chip"):
            cores = getattr(info, attr, None)
            if cores:
                num_splits = max(1, min(int(cores), 2))
                break
    except Exception:
        pass
    return num_splits, vmem_limit


def similarity_loss(
    q: jax.Array,
    k: jax.Array,
    temperature: float,
    *,
    tile_bytes: int = 8 * 1024 * 1024,   # bytes per input per grid step
    num_splits: int | None = None,       # None -> detected TensorCore count
    vmem_limit_bytes: int | None = None, # None -> detected / safe default
    min_kernel_elems: int = 1 << 21,     # below this, fused XLA wins
) -> jax.Array:
    """Pallas implementation of SimilarityLoss.forward. Returns a scalar float32."""
    assert q.shape == k.shape and q.ndim == 2, "q, k must both be [N, C]"
    n, c = q.shape
    lanes = 128
    total = n * c
    scale = -1.0 / (temperature * n)     # mean over the REAL batch n, negated

    itemsize = jnp.dtype(q.dtype).itemsize
    sub = 8 * max(1, 4 // itemsize)      # sublane packing multiple (8 f32, 16 bf16)
    m_full = total // lanes              # lane-dense rows available

    # Fast / fallback path: tiny inputs (launch overhead dominates) or shapes
    # where the lane-dense [M,128] view is not a free reshape.
    # TODO(synk): N*C % 128 != 0 falls back to a fused XLA reduction (still
    # memory-bound and near-roofline; avoids any padding copy).
    if total < min_kernel_elems or total % lanes != 0 or m_full < sub:
        dot = jnp.sum(q.astype(jnp.float32) * k.astype(jnp.float32))
        return (dot * jnp.float32(scale)).astype(jnp.float32)

    ns_default, vmem_default = _tpu_defaults()
    if num_splits is None:
        num_splits = ns_default
    if vmem_limit_bytes is None:
        vmem_limit_bytes = vmem_default

    # Free reshape (row-major contiguous, total % 128 == 0): no copy, no pad.
    qf = q.reshape(m_full, lanes)
    kf = k.reshape(m_full, lanes)

    # Tile rows from the byte target, rounded down to the sublane multiple.
    tile_rows = max(sub, (tile_bytes // (lanes * itemsize)) // sub * sub)

    if m_full < num_splits * sub:        # too few rows to split usefully
        num_splits = 1
    per_split = m_full // num_splits
    tile_rows = min(tile_rows, max(sub, (per_split // sub) * sub))
    steps = per_split // tile_rows       # >= 1
    rows_kernel = num_splits * steps * tile_rows   # exactly-covered prefix

    in_spec = pl.BlockSpec((tile_rows, lanes), lambda s, i: (s * steps + i, 0))

    partials = pl.pallas_call(
        _similarity_partial_kernel,
        out_shape=jax.ShapeDtypeStruct((num_splits, 8, lanes), jnp.float32),
        grid_spec=pltpu.PrefetchScalarGridSpec(
            num_scalar_prefetch=0,
            grid=(num_splits, steps),
            in_specs=[in_spec, in_spec],
            out_specs=pl.BlockSpec((1, 8, lanes), lambda s, i: (s, 0, 0)),
        ),
        compiler_params=pltpu.CompilerParams(
            # axis 0: independent per-split partials (megacore-shardable)
            # axis 1: sequential accumulation into the resident output block
            dimension_semantics=("parallel", "arbitrary"),
            vmem_limit_bytes=vmem_limit_bytes,
        ),
    )(qf, kf)

    acc = jnp.sum(partials, dtype=jnp.float32)

    # Tail rows not covered by the kernel prefix: tiny fused slice+reduce in
    # XLA (reads only the tail bytes; never copies/pads the full arrays).
    if rows_kernel < m_full:
        tail = jnp.sum(qf[rows_kernel:].astype(jnp.float32) *
                       kf[rows_kernel:].astype(jnp.float32))
        acc = acc + tail

    return (acc * jnp.float32(scale)).astype(jnp.float32)


if __name__ == "__main__":
    temperature = 0.5

    def ref_loss(q, k):
        return -jnp.mean(jnp.einsum("nc,nc->n", q, k) / temperature)

    # 1) Pallas kernel path: small shape consistent with the module (batch 66,
    #    embedding 256). Tiny tile_bytes + min_kernel_elems=0 force the kernel
    #    and exercise multi-step accumulation plus the XLA tail path.
    N, C = 66, 256
    kq, kk = jax.random.split(jax.random.PRNGKey(0))
    q = jax.random.normal(kq, (N, C), dtype=jnp.float32)
    k = jax.random.normal(kk, (N, C), dtype=jnp.float32)
    loss = jax.block_until_ready(
        similarity_loss(q, k, temperature, tile_bytes=8192, min_kernel_elems=0))
    ref = ref_loss(q, k)
    assert jnp.allclose(loss, ref, rtol=1e-4, atol=1e-4), (loss, ref)

    # 2) Small-input fast path (default thresholds skip the pallas_call).
    N2, C2 = 8, 32
    kq2, kk2 = jax.random.split(jax.random.PRNGKey(1))
    q2 = jax.random.normal(kq2, (N2, C2), dtype=jnp.float32)
    k2 = jax.random.normal(kk2, (N2, C2), dtype=jnp.float32)
    loss2 = jax.block_until_ready(similarity_loss(q2, k2, temperature))
    ref2 = ref_loss(q2, k2)
    assert jnp.allclose(loss2, ref2, rtol=1e-4, atol=1e-4), (loss2, ref2)

    print("KERNEL_OK")
</pallas_src>

<mosaic_0001>
module attributes {stable_mosaic.version = 11 : i64} {
  func.func @_similarity_partial_kernel(%arg0: i32, %arg1: i32, %arg2: memref<16x128xf32, #tpu.memory_space<vmem>>, %arg3: memref<16x128xf32, #tpu.memory_space<vmem>>, %arg4: memref<1x8x128xf32, #tpu.memory_space<vmem>>) attributes {dimension_semantics = [#tpu.dimension_semantics<parallel>, #tpu.dimension_semantics<arbitrary>], iteration_bounds = array<i64: 1, 8>, scalar_prefetch = 0 : i64, scratch_operands = 0 : i64, tpu.core_type = #tpu.core_type<tc>, window_params = [{transform_indices = @transform_0, window_bounds = array<i64: 16, 128>}, {transform_indices = @transform_1, window_bounds = array<i64: 16, 128>}, {transform_indices = @transform_2, window_bounds = array<i64: 1, 8, 128>}]} {
    %c0_i32 = arith.constant 0 : i32
    %0 = arith.cmpi eq, %arg1, %c0_i32 : i32
    %1 = arith.extui %0 : i1 to i32
    %c0_i32_0 = arith.constant 0 : i32
    %2 = arith.cmpi ne, %1, %c0_i32_0 : i32
    scf.if %2 {
      %cst_10 = arith.constant 0.000000e+00 : f32
      %12 = vector.broadcast %cst_10 : f32 to vector<1x8x128xf32>
      %c0_11 = arith.constant 0 : index
      %c0_12 = arith.constant 0 : index
      %c0_13 = arith.constant 0 : index
      %13 = vector.load %arg4[%c0_11, %c0_12, %c0_13] : memref<1x8x128xf32, #tpu.memory_space<vmem>>, vector<1x8x128xf32>
      tpu.vector_store %arg4[%c0_11, %c0_12, %c0_13], %12 {strides = array<i32>} : memref<1x8x128xf32, #tpu.memory_space<vmem>>, vector<1x8x128xf32>,
    } else {
    }
    %c0 = arith.constant 0 : index
    %c0_1 = arith.constant 0 : index
    %3 = vector.load %arg2[%c0, %c0_1] : memref<16x128xf32, #tpu.memory_space<vmem>>, vector<16x128xf32>
    %c0_2 = arith.constant 0 : index
    %c0_3 = arith.constant 0 : index
    %4 = vector.load %arg3[%c0_2, %c0_3] : memref<16x128xf32, #tpu.memory_space<vmem>>, vector<16x128xf32>
    %5 = arith.mulf %3, %4 : vector<16x128xf32>
    %c0_4 = arith.constant 0 : index
    %c0_5 = arith.constant 0 : index
    %c0_6 = arith.constant 0 : index
    %6 = vector.load %arg4[%c0_4, %c0_5, %c0_6] : memref<1x8x128xf32, #tpu.memory_space<vmem>>, vector<1x8x128xf32>
    %7 = vector.shape_cast %5 : vector<16x128xf32> to vector<2x8x128xf32>
    %cst = arith.constant dense<0.000000e+00> : vector<8x128xf32>
    %8 = vector.multi_reduction <add>, %7, %cst [0] : vector<2x8x128xf32> to vector<8x128xf32>
    %9 = vector.shape_cast %8 : vector<8x128xf32> to vector<1x8x128xf32>
    %10 = arith.addf %6, %9 : vector<1x8x128xf32>
    %c0_7 = arith.constant 0 : index
    %c0_8 = arith.constant 0 : index
    %c0_9 = arith.constant 0 : index
    %11 = vector.load %arg4[%c0_7, %c0_8, %c0_9] : memref<1x8x128xf32, #tpu.memory_space<vmem>>, vector<1x8x128xf32>
    tpu.vector_store %arg4[%c0_7, %c0_8, %c0_9], %10 {strides = array<i32>} : memref<1x8x128xf32, #tpu.memory_space<vmem>>, vector<1x8x128xf32>,
    return
  }
  func.func @transform_0(%arg0: i32, %arg1: i32) -> (i32, i32) {
    %c8_i32 = arith.constant 8 : i32
    %0 = arith.muli %arg0, %c8_i32 : i32
    %1 = arith.addi %0, %arg1 : i32
    %c0_i32 = arith.constant 0 : i32
    %c0_i32_0 = arith.constant 0 : i32
    return %1, %c0_i32 : i32, i32
  }
  func.func @transform_1(%arg0: i32, %arg1: i32) -> (i32, i32) {
    %c8_i32 = arith.constant 8 : i32
    %0 = arith.muli %arg0, %c8_i32 : i32
    %1 = arith.addi %0, %arg1 : i32
    %c0_i32 = arith.constant 0 : i32
    %c0_i32_0 = arith.constant 0 : i32
    return %1, %c0_i32 : i32, i32
  }
  func.func @transform_2(%arg0: i32, %arg1: i32) -> (i32, i32, i32) {
    %c0_i32 = arith.constant 0 : i32
    %c0_i32_0 = arith.constant 0 : i32
    %c0_i32_1 = arith.constant 0 : i32
    return %arg0, %c0_i32, %c0_i32_0 : i32, i32, i32
  }
}

</mosaic_0001>

<bundles_post_ra>
// kernel: tpu_custom_call.1
= control target key start
LH: loop header
LB: loop body
LE: loop exit
PB: predicated region body
PF: predicated region fallthrough
CT: control target
= control target key end

     0   :  { %7 = vsyncpa [#allocation3], 0  ;;  %s735_s0 = inlined_call_operand.hbm [shape: f32[132,128], index: 0, kind: input, shape index: {}]   ;;  %s736_s1 = inlined_call_operand.hbm [shape: f32[132,128], index: 1, kind: input, shape index: {}]   ;;  %s737_s2 = inlined_call_operand.hbm [shape: f32[1,8,128], index: 2, kind: output, shape index: {}]  }
   0x1   :  { %9 = vsyncpa [#allocation3 + $0x1], 0 }
   0x2   :  { %10 = vsyncpa [#allocation6], 0 }
   0x3   :  { %12 = vsyncpa [#allocation6 + $0x1], 0 }
   0x4   :  { %13 = vsyncpa [#allocation4], 0  ;;  %s609_s9 = smov 0   ;;  %s611_s10 = smov 0  }
   0x5   :  { %s613_s11 = smov 0   ;;  %s615_s12 = smov 0  }
   0x6   :  { %s617_s13 = smov 0   ;;  %s619_s14 = smov 0  }
   0x7 LB: > { %s357_s15 = sadd.s32 4294967295, %s584_s14   ;;  %s28_s16 = sadd.s32 1, %s580_s13  ;;  %s584_s14 = sphi %s619_s14, %s19_s14   ;;  %s580_s13 = sphi %s617_s13, %s745_s13   ;;  %s576_s12 = sphi %s615_s12, %s744_s12   ;;  %s572_s11 = sphi %s613_s11, %s743_s11   ;;  %s568_s10 = sphi %s611_s10, %s742_s10   ;;  %s564_s9 = sphi %s609_s9, %s741_s9  }
   0x8   : > { %p29_p0 = scmp.ge.s32.totalorder %s28_s16, 8  ;;  %s42_s17 = sadd.s32 1, %s572_s11 }
   0x9   : > { %p49_p1 = scmp.ne.s32.totalorder %s572_s11, %s568_s10  ;;  %p50_p2 = scmp.eq.s32.totalorder %s584_s14, 0 }
   0xa   : > { %s747_s16 = smov (%p29_p0, %s28_s16), 0  ;;  %p55_p4 = scmp.ne.s32.totalorder %s568_s10, %s564_s9 }
   0xb   : > { %p645_p3 = por %p50_p2, %p49_p1  ;;  %s39_s19 = ssub.s32 %s580_s13, %s747_s16 }
   0xc   : > { %p56_p5 = scmp.eq.s32.totalorder %s357_s15, 0  ;;  %p40_p6 = scmp.eq.s32.totalorder %s39_s19, 0 }
   0xd   : > { %p359_p8 = scmp.ge.s32.totalorder %s584_s14, 8 }
   0xe   : > { %p654_p7 = por %p56_p5, %p55_p4 }
   0xf   : > { %s659_s21 = scalar_select %p40_p6, %s572_s11, %s42_s17  }
  0x10   : > { %131 = sbr.rel (%p359_p8) target bundleno = 65 (0x41), region = 16 }
  0x15   : > { %134 = sbr.rel (!%p645_p3) target bundleno = 43 (0x2b), region = 20  ;;  %s135_s22 = sand.u32 (%p645_p3), 1, %s572_s11  }
  0x16   : > { %s360_s23 = sshll.u32 (%p645_p3), %s135_s22, 4  ;;  %s665_s24 = scalar_lea.sflag (%p645_p3), [#allocation3], %s135_s22 }
  0x17   : > { %s139_s25 = scalar_lea.vmem (%p645_p3), [#allocation2], %s360_s23  ;;  %s382_s26 = sshll.u32 (%p645_p3), %s580_s13, 8 }
  0x18   : > { %s152_s29 = scalar_lea.hbm (%p645_p3), %s735_s0, %s382_s26  ;;  %s154_s30 = sshll.u32 (%p645_p3), %s139_s25, 4  ;;  %s155_s30 = int_to_ptr.vmem [resolvable:$true] %s154_s30 }
  0x19   : > { %s446_s3 = scalar_lea.hbm (%p645_p3), %s152_s29, 256  ;;  %s450_s6 = scalar_lea.hbm (%p645_p3), %s735_s0, 2176 }
  0x1a   : > { %p447_p9 = scmp.ne.s32.totalorder %s152_s29, %s446_s3  ;;  %p452_p10 = scmp.lt.s32.totalorder %s450_s6, %s446_s3 }
  0x1c   : > { %p454_p11 = pnand %p452_p10, %p447_p9 }
  0x1e   : > { %457 = shalt.err (!%p454_p11)
}
  0x1f   : > { %s458_s7 = scalar_lea.vmem %s155_s30, 256  ;;  %s586_s8 = smov [#allocation2]  }
  0x20   : > { %p459_p12 = scmp.ne.s32.totalorder %s155_s30, %s458_s7  ;;  %s462_s9 = sshll.u32 %s586_s8, 4  ;;  %s463_s9 = int_to_ptr.vmem [resolvable:$false] %s462_s9 }
  0x21   : > { %s464_s17 = scalar_lea.vmem %s463_s9, 512  ;;  %p465_p13 = scmp.lt.s32.totalorder %s155_s30, %s463_s9 }
  0x22   : > { %p466_p0 = scmp.lt.s32.totalorder %s464_s17, %s458_s7 }
  0x24   : > { %p467_p1 = por %p466_p0, %p465_p13 }
  0x26   : > { %p468_p2 = pnand %p467_p1, %p459_p12 }
  0x28   : > { %471 = shalt.err (!%p468_p2)
}
  0x29   : > { %s587_s19 = smov 128   ;;  %s588_s22 = smov 8  }
  0x2a   : > { %160 = dma.hbm_to_vmem [thread:$0]  %s152_s29, 256, %s155_s30, %s665_s24, %s587_s19, %s587_s19, %s588_s22  }
  0x2b PF: > { %163 = sbr.rel (!%p645_p3) target bundleno = 65 (0x41), region = 24  ;;  %s164_s23 = sand.u32 (%p645_p3), 1, %s572_s11  }
  0x2c   : > { %s367_s25 = sshll.u32 (%p645_p3), %s164_s23, 4  ;;  %s678_s26 = scalar_lea.sflag (%p645_p3), [#allocation6], %s164_s23 }
  0x2d   : > { %s168_s27 = scalar_lea.vmem (%p645_p3), [#allocation5], %s367_s25  ;;  %s383_s28 = sshll.u32 (%p645_p3), %s580_s13, 8 }
  0x2e   : > { %s181_s5 = scalar_lea.hbm (%p645_p3), %s736_s1, %s383_s28  ;;  %s183_s6 = sshll.u32 (%p645_p3), %s168_s27, 4  ;;  %s184_s6 = int_to_ptr.vmem [resolvable:$true] %s183_s6 }
  0x2f   : > { %s472_s7 = scalar_lea.hbm (%p645_p3), %s181_s5, 256  ;;  %s476_s18 = scalar_lea.hbm (%p645_p3), %s736_s1, 2176 }
  0x30   : > { %p473_p4 = scmp.ne.s32.totalorder %s181_s5, %s472_s7  ;;  %p478_p3 = scmp.lt.s32.totalorder %s476_s18, %s472_s7 }
  0x32   : > { %p480_p5 = pnand %p478_p3, %p473_p4 }
  0x34   : > { %483 = shalt.err (!%p480_p5)
}
  0x35   : > { %s484_s30 = scalar_lea.vmem %s184_s6, 256  ;;  %s589_s8 = smov [#allocation5]  }
  0x36   : > { %p485_p6 = scmp.ne.s32.totalorder %s184_s6, %s484_s30  ;;  %s488_s9 = sshll.u32 %s589_s8, 4  ;;  %s489_s9 = int_to_ptr.vmem [resolvable:$false] %s488_s9 }
  0x37   : > { %s490_s17 = scalar_lea.vmem %s489_s9, 512  ;;  %p491_p8 = scmp.lt.s32.totalorder %s184_s6, %s489_s9 }
  0x38   : > { %p492_p9 = scmp.lt.s32.totalorder %s490_s17, %s484_s30 }
  0x3a   : > { %p493_p10 = por %p492_p9, %p491_p8 }
  0x3c   : > { %p494_p11 = pnand %p493_p10, %p485_p6 }
  0x3e   : > { %497 = shalt.err (!%p494_p11)
}
  0x3f   : > { %s590_s19 = smov 128   ;;  %s591_s22 = smov 8  }
  0x40   : > { %189 = dma.hbm_to_vmem [thread:$0]  %s181_s5, 256, %s184_s6, %s678_s26, %s590_s19, %s590_s19, %s591_s22  }
  0x41 PF: > { %p374_p12 = scmp.ge.s32.totalorder %s584_s14, 1  ;;  %p191_p13 = scmp.lt.s32.totalorder %s584_s14, 9 }
  0x43   : > { %p192_p0 = pnand %p374_p12, %p191_p13 }
  0x44   : > { %s197_s23 = sand.u32 (!%p192_p0), 1, %s568_s10  }
  0x45   : > { %195 = sbr.rel (%p192_p0) target bundleno = 101 (0x65), region = 28  ;;  %s375_s25 = sshll.u32 (!%p192_p0), %s197_s23, 4 }
  0x46   : > { %s198_s27 = scalar_lea.sflag (!%p192_p0), [#allocation3], %s197_s23  ;;  %s201_s28 = scalar_lea.vmem (!%p192_p0), [#allocation2], %s375_s25 }
  0x4a   : > { %547 = dma.done.wait (%p654_p7), %s198_s27, 256  }
  0x4b   : > { %549 = vsyncadd (%p654_p7), %s198_s27, 4294967040  ;;  %s207_s26 = scalar_lea.sflag [#allocation6], %s197_s23  ;;  %s210_s3 = scalar_lea.vmem [#allocation5], %s375_s25 }
  0x4c   : > { %551 = dma.done.wait (%p654_p7), %s207_s26, 256  }
  0x4d   : > { %553 = vsyncadd (%p654_p7), %s207_s26, 4294967040  ;;  %p377_p1 = scmp.ne.s32.totalorder %s576_s12, 0 }
  0x4f   : > { %248 = sbr.rel (%p377_p1) target bundleno = 86 (0x56), region = 40 }
  0x54   : > { %v592_v0 = vmov 0.0  }
  0x55   : > { %249 = vst [vmem:[#allocation7] sm:$0xff] %v592_v0 }
  0x56 PF: > { %v250_v1 = vld [vmem:[%s201_s28] sm:$0xff]  ;;  %v251_v2 = vld [vmem:[%s201_s28 + $0x8] sm:$0xff]  ;;  %s593_s4 = smov [#allocation7]   ;;  %p702_p2 = scmp.eq.s32.totalorder %s357_s15, 7 }
  0x57   : > { %v252_v3 = vld [vmem:[%s210_s3] sm:$0xff]  ;;  %v253_v4 = vld [vmem:[%s210_s3 + $0x8] sm:$0xff]  ;;  %s269_s5 = sshll.u32 %s593_s4, 4  ;;  %s270_s5 = int_to_ptr.vmem [resolvable:$true] %s269_s5 }
  0x58   : > { %v254_v5 = vmul.f32 %v252_v3, %v250_v1  ;;  %v255_v6 = vmul.f32 %v253_v4, %v251_v2  ;;  %s498_s12 = scalar_lea.vmem %s270_s5, 128  ;;  %p505_p5 = scmp.lt.s32.totalorder %s270_s5, %s270_s5 }
  0x59   : > { %p499_p7 = scmp.ne.s32.totalorder %s270_s5, %s498_s12  ;;  %p506_p6 = scmp.lt.s32.totalorder %s498_s12, %s498_s12 }
  0x5a   : > { %v257_v8 = vadd.f32 %v255_v6, %v254_v5 }
  0x5b   : > { %p500_p4 = pnand %p499_p7, %p702_p2  ;;  %p507_p8 = por %p506_p6, %p505_p5 }
  0x5c   : > { %v256_v7 = vld [vmem:[#allocation7] sm:$0xff] }
  0x5d   : > { %v258_v9 = vadd.f32 %v257_v8, %v256_v7  ;;  %p501_p3 = pneg %p500_p4 }
  0x5f   : > { %259 = vst [vmem:[#allocation7] sm:$0xff] %v258_v9  ;;  %p508_p9 = pnand %p507_p8, %p501_p3 }
  0x61   : > { %511 = shalt.err (!%p508_p9)
}
  0x62   : > { %387 = dma.vmem_to_hbm [thread:$0]  (%p702_p2), %s270_s5, 128, %s737_s2, [#allocation4]  }
  0x63   : > { %555 = dma.done.wait (%p702_p2), [#allocation4], 128  }
  0x64   : > { %557 = vsyncadd (%p702_p2), [#allocation4], 4294967168 }
  0x65 PF: > { %s19_s14 = sadd.s32 1, %s584_s14   ;;  %s741_s9 = smov %s568_s10 }
  0x66   : > { %p16_p10 = scmp.ge.s32.totalorder %s19_s14, 10   ;;  %s742_s10 = smov %s572_s11 }
  0x67   : > { %s743_s11 = smov %s659_s21  ;;  %s744_s12 = smov %s580_s13 }
  0x68   : > { %s745_s13 = smov %s747_s16  ;;  %18 = sbr.rel (!%p16_p10) target bundleno = 7 (0x7), region = 83 }
  0x6d   :  { %282 = vsyncpa [#allocation3], 1 }
  0x6e   :  { %284 = vsyncpa [#allocation3 + $0x1], 1 }
  0x6f   :  { %285 = vsyncpa [#allocation6], 1 }
  0x70   :  { %287 = vsyncpa [#allocation6 + $0x1], 1 }
  0x71   :  { %288 = vsyncpa [#allocation4], 1 }
  0x72   :  { %290 = vsyncpa [#allocation4 + $0x1], 1 }

</bundles_post_ra>
